<compile_context>
chip_gen: v7x
topology: tpu7x:2x2x1
jax: 0.10.0
libtpu: 0.0.40
codegen_flags: <defaults>
</compile_context>

<pallas_src>
import numpy as np
import jax
import jax.numpy as jnp
from jax.experimental import pallas as pl
from jax.experimental.pallas import tpu as pltpu


def build_grid(resolution):
    """Same as the PyTorch build_grid, returns (1, H, W, 4) float32."""
    ranges = [np.linspace(0.0, 1.0, num=res) for res in resolution]
    grid = np.meshgrid(*ranges, sparse=False, indexing="ij")
    grid = np.stack(grid, axis=-1)
    grid = np.reshape(grid, [resolution[0], resolution[1], -1])
    grid = np.expand_dims(grid, axis=0)
    grid = grid.astype(np.float32)
    return np.concatenate([grid, 1.0 - grid], axis=-1)


# ---------------------------------------------------------------------------
# Stage 1: position embedding (runs once, tiny).
# ---------------------------------------------------------------------------
def _embed_kernel(grid_ref, w_ref, b_ref, emb_ref):
    # grid_ref: (HW, 4)   w_ref: (4, C)   b_ref: (1, C)   emb_ref: (HW, C)
    emb = jnp.dot(grid_ref[...], w_ref[...],
                  preferred_element_type=jnp.float32) + b_ref[...]
    emb_ref[...] = emb.astype(emb_ref.dtype)


# ---------------------------------------------------------------------------
# Stage 2: streaming broadcast-add (the real HBM-bound work).
# ---------------------------------------------------------------------------
def _add_embed_kernel(emb_ref, x_ref, o_ref):
    # All refs are (tr, lanes): batch dim is squeezed by the BlockSpec.
    o_ref[...] = x_ref[...] + emb_ref[...]


def _lane_dense_layout(H, W, C):
    """Fold the trailing dims of (H, W, C) into (rows, lanes) with
    lanes % 128 == 0 when possible, to get unmasked lane-dense stores.
    All folds are row-major flattens, so no relayout copy is introduced."""
    if C % 128 == 0:
        return H * W, C
    if (W * C) % 128 == 0:
        return H, W * C
    if (H * W * C) % 128 == 0:
        return (H * W * C) // 128, 128
    return H * W, C  # fallback: correct, just lane-sparse


def _pick_row_tile(rows, lanes, itemsize, target_bytes=4 << 20):
    """Fixed ~target_bytes tile, dtype-aware sublane alignment; the grid uses
    pl.cdiv so the (possibly ragged) last block is handled by Pallas."""
    align = max(8, 32 // itemsize)          # 8 f32, 16 bf16, 32 int8/fp8
    if rows * lanes * itemsize <= target_bytes:
        return rows                         # full extent: always legal
    tr = (target_bytes // (lanes * itemsize)) // align * align
    tr = max(align, tr)
    if tr >= rows:
        return rows
    return tr


def soft_position_embed(inputs_nhwc, grid_param, weight, bias):
    """inputs_nhwc: (B, H, W, C); grid_param: (1, H, W, 4);
    weight: (C, 4) (PyTorch Linear layout); bias: (C,)."""
    B, H, W, C = inputs_nhwc.shape
    HW = H * W
    dtype = inputs_nhwc.dtype
    itemsize = jnp.dtype(dtype).itemsize

    # ---- Stage 1: emb = grid @ W.T + b, computed exactly once (not per batch).
    g = grid_param.reshape(HW, 4).astype(jnp.float32)
    wt = weight.T.astype(jnp.float32)            # (4, C)
    b2 = bias.reshape(1, C).astype(jnp.float32)  # (1, C)
    emb = pl.pallas_call(
        _embed_kernel,
        out_shape=jax.ShapeDtypeStruct((HW, C), dtype),
    )(g, wt, b2)

    # ---- Stage 2: lane-dense streaming add, grid = (row_tiles, batch) with
    # batch INNERMOST so the shared emb tile is fetched once per row tile.
    rows, lanes = _lane_dense_layout(H, W, C)
    x = inputs_nhwc.reshape(B, rows, lanes)
    e = emb.reshape(rows, lanes)

    tr = _pick_row_tile(rows, lanes, itemsize)
    n_row_tiles = pl.cdiv(rows, tr)

    cost = pl.CostEstimate(
        flops=B * rows * lanes,                                   # one add/elem
        transcendentals=0,
        bytes_accessed=(2 * B + 1) * rows * lanes * itemsize,     # in + out + emb
    )

    out = pl.pallas_call(
        _add_embed_kernel,
        out_shape=jax.ShapeDtypeStruct((B, rows, lanes), dtype),
        grid_spec=pltpu.PrefetchScalarGridSpec(
            num_scalar_prefetch=0,
            grid=(n_row_tiles, B),
            in_specs=[
                # emb: block index constant over inner (batch) axis -> no re-DMA.
                pl.BlockSpec((tr, lanes), lambda r, b: (r, 0)),
                # inputs: batch dim squeezed out of the kernel view.
                pl.BlockSpec((None, tr, lanes), lambda r, b: (b, r, 0)),
            ],
            out_specs=pl.BlockSpec((None, tr, lanes), lambda r, b: (b, r, 0)),
        ),
        compiler_params=pltpu.CompilerParams(
            dimension_semantics=("parallel", "parallel"),
            vmem_limit_bytes=32 * 1024 * 1024,
        ),
        cost_estimate=cost,
    )(e, x)

    return out.reshape(B, H, W, C)


if __name__ == "__main__":
    # Small shapes: batch=2, resolution=(16,16), hidden=32.
    B, H, W, HIDDEN = 2, 16, 16, 32

    key = jax.random.PRNGKey(0)
    k_w, k_b, k_x = jax.random.split(key, 3)

    # Deterministic parameter init (PyTorch nn.Linear-style uniform bounds).
    bound = 1.0 / np.sqrt(4.0)
    weight = jax.random.uniform(k_w, (HIDDEN, 4), jnp.float32, -bound, bound)
    bias = jax.random.uniform(k_b, (HIDDEN,), jnp.float32, -bound, bound)
    grid_param = jnp.asarray(build_grid((H, W)))          # (1, H, W, 4)

    inputs = jax.random.normal(k_x, (B, H, W, HIDDEN), jnp.float32)

    out = soft_position_embed(inputs, grid_param, weight, bias)
    out = jax.block_until_ready(out)

    # Reference check in plain JAX.
    ref = inputs + (jnp.einsum("ohwf,cf->ohwc", grid_param, weight) + bias)
    np.testing.assert_allclose(np.asarray(out), np.asarray(ref),
                               rtol=1e-5, atol=1e-5)
    print("KERNEL_OK")
</pallas_src>

<mosaic_0001>
module attributes {stable_mosaic.version = 11 : i64} {
  func.func @_embed_kernel(%arg0: memref<256x4xf32, #tpu.memory_space<vmem>>, %arg1: memref<4x32xf32, #tpu.memory_space<vmem>>, %arg2: memref<1x32xf32, #tpu.memory_space<vmem>>, %arg3: memref<256x32xf32, #tpu.memory_space<vmem>>) attributes {dimension_semantics = [], scalar_prefetch = 0 : i64, scratch_operands = 0 : i64, tpu.core_type = #tpu.core_type<tc>} {
    %c0 = arith.constant 0 : index
    %c0_0 = arith.constant 0 : index
    %0 = vector.load %arg0[%c0, %c0_0] : memref<256x4xf32, #tpu.memory_space<vmem>>, vector<256x4xf32>
    %c0_1 = arith.constant 0 : index
    %c0_2 = arith.constant 0 : index
    %1 = vector.load %arg1[%c0_1, %c0_2] : memref<4x32xf32, #tpu.memory_space<vmem>>, vector<4x32xf32>
    %cst = arith.constant dense<0.000000e+00> : vector<256x32xf32>
    %2 = tpu.matmul %0, %1, %cst {dimension_numbers = #tpu.dot_dimension_numbers<[1], [0], [0], [1], [0, 0, 1, 1], [], []>} : vector<256x4xf32>, vector<4x32xf32>, vector<256x32xf32> -> vector<256x32xf32>
    %c0_3 = arith.constant 0 : index
    %c0_4 = arith.constant 0 : index
    %3 = vector.load %arg2[%c0_3, %c0_4] : memref<1x32xf32, #tpu.memory_space<vmem>>, vector<1x32xf32>
    %4 = vector.broadcast %3 : vector<1x32xf32> to vector<256x32xf32>
    %5 = arith.addf %2, %4 : vector<256x32xf32>
    %c0_5 = arith.constant 0 : index
    %c0_6 = arith.constant 0 : index
    %6 = vector.load %arg3[%c0_5, %c0_6] : memref<256x32xf32, #tpu.memory_space<vmem>>, vector<256x32xf32>
    tpu.vector_store %arg3[%c0_5, %c0_6], %5 {strides = array<i32>} : memref<256x32xf32, #tpu.memory_space<vmem>>, vector<256x32xf32>,
    return
  }
}

</mosaic_0001>

<bundles_post_ra>
// kernel: tpu_custom_call.1
= control target key start
LH: loop header
LB: loop body
LE: loop exit
PB: predicated region body
PF: predicated region fallthrough
CT: control target
= control target key end

     0   :  { %vm151_vm0 = vcmask 1043456   ;;  %vm54_vm1 = vcmask 31744   ;;  %vm380_vm2 = vcmask 261120   ;;  %s852_s1 = inlined_call_operand.vmem [shape: f32[4,32], index: 1, kind: input, shape index: {}]   ;;  %s853_s0 = inlined_call_operand.vmem [shape: f32[256,4], index: 0, kind: input, shape index: {}]   ;;  %s854_s2 = inlined_call_operand.vmem [shape: f32[1,32], index: 2, kind: input, shape index: {}]   ;;  %s855_s3 = inlined_call_operand.vmem [shape: f32[256,32], index: 3, kind: output, shape index: {}]  }
   0x1   :  { %v46_v0 = vld [vmem:[%s852_s1] sm:$0xf]  ;;  %v15_v3 = vld [vmem:[%s853_s0 + $0x8] sm:$0xff]  ;;  %v16_v5 = vld [vmem:[%s853_s0 + $0x10] sm:$0xff] }
   0x2   :  { %v14_v1 = vld [vmem:[%s853_s0] sm:$0xff]  ;;  %484 = vmatprep.subr.msk.mxu0 %vm151_vm0, %v46_v0  ;;  %534 = vmatprep.subr.msk.mxu1 %vm151_vm0, %v46_v0  ;;  %v31_v4 = vld [vmem:[%s853_s0 + $0x88] sm:$0xff]  ;;  %v32_v6 = vld [vmem:[%s853_s0 + $0x90] sm:$0xff] }
   0x3   :  { %v30_v2 = vld [vmem:[%s853_s0 + $0x80] sm:$0xff]  ;;  %485 = vmatpush3.msk.msra.mxu0 %vm151_vm0, %v46_v0  ;;  %535 = vmatpush3.msk.msra.mxu1 %vm151_vm0, %v46_v0  ;;  %v17_v7 = vld [vmem:[%s853_s0 + $0x18] sm:$0xff]  ;;  %v19_v11 = vld [vmem:[%s853_s0 + $0x28] sm:$0xff] }
   0x4   :  { %486 = vmatprep.mubr.msk.f32.mxu0 %vm54_vm1, %v14_v1  ;;  %510 = vmatprep.mubr.msk.f32.mxu1 %vm54_vm1, %v30_v2  ;;  %v33_v8 = vld [vmem:[%s853_s0 + $0x98] sm:$0xff]  ;;  %v18_v9 = vld [vmem:[%s853_s0 + $0x20] sm:$0xff]  ;;  %v35_v12 = vld [vmem:[%s853_s0 + $0xa8] sm:$0xff] }
   0x5   :  { %487 = vmatmul.mubr.msk.f32.vlgmr.msra.gmra.mrb[0].mxu0 %vm54_vm1, %v15_v3  ;;  %511 = vmatmul.mubr.msk.f32.vlgmr.msra.gmra.mrb[0].mxu1 %vm54_vm1, %v31_v4  ;;  %v34_v10 = vld [vmem:[%s853_s0 + $0xa0] sm:$0xff]  ;;  %v20_v13 = vld [vmem:[%s853_s0 + $0x30] sm:$0xff]  ;;  %v21_v15 = vld [vmem:[%s853_s0 + $0x38] sm:$0xff] }
   0x6   :  { %489 = vmatprep.mubr.msk.f32.mxu0 %vm54_vm1, %v16_v5  ;;  %513 = vmatprep.mubr.msk.f32.mxu1 %vm54_vm1, %v32_v6  ;;  %v36_v14 = vld [vmem:[%s853_s0 + $0xb0] sm:$0xff]  ;;  %v37_v16 = vld [vmem:[%s853_s0 + $0xb8] sm:$0xff]  ;;  %v22_v17 = vld [vmem:[%s853_s0 + $0x40] sm:$0xff] }
   0x7   :  { %v38_v18 = vld [vmem:[%s853_s0 + $0xc0] sm:$0xff]  ;;  %v23_v19 = vld [vmem:[%s853_s0 + $0x48] sm:$0xff]  ;;  %v24_v21 = vld [vmem:[%s853_s0 + $0x50] sm:$0xff] }
   0x8   :  { %v39_v20 = vld [vmem:[%s853_s0 + $0xc8] sm:$0xff]  ;;  %v40_v22 = vld [vmem:[%s853_s0 + $0xd0] sm:$0xff]  ;;  %v25_v23 = vld [vmem:[%s853_s0 + $0x58] sm:$0xff] }
   0x9   :  { %490 = vmatmul.mubr.msk.f32.gmra.mrb[2].mxu0 %vm54_vm1, %v17_v7  ;;  %514 = vmatmul.mubr.msk.f32.gmra.mrb[2].mxu1 %vm54_vm1, %v33_v8  ;;  %v41_v24 = vld [vmem:[%s853_s0 + $0xd8] sm:$0xff]  ;;  %v26_v25 = vld [vmem:[%s853_s0 + $0x60] sm:$0xff]  ;;  %v27_v27 = vld [vmem:[%s853_s0 + $0x68] sm:$0xff] }
   0xa   :  { %492 = vmatprep.mubr.msk.f32.mxu0 %vm54_vm1, %v18_v9  ;;  %516 = vmatprep.mubr.msk.f32.mxu1 %vm54_vm1, %v34_v10  ;;  %v42_v26 = vld [vmem:[%s853_s0 + $0xe0] sm:$0xff]  ;;  %v43_v28 = vld [vmem:[%s853_s0 + $0xe8] sm:$0xff]  ;;  %v28_v29 = vld [vmem:[%s853_s0 + $0x70] sm:$0xff] }
   0xb   :  { %v44_v30 = vld [vmem:[%s853_s0 + $0xf0] sm:$0xff]  ;;  %v29_v31 = vld [vmem:[%s853_s0 + $0x78] sm:$0xff]  ;;  %v690_v33 = vld [vmem:[%s854_s2] ss:$0 sm:$0xff] }
   0xc   :  { %v45_v32 = vld [vmem:[%s853_s0 + $0xf8] sm:$0xff] }
   0xd   :  { %493 = vmatmul.mubr.msk.f32.gmra.mrb[4].mxu0 %vm54_vm1, %v19_v11  ;;  %517 = vmatmul.mubr.msk.f32.gmra.mrb[4].mxu1 %vm54_vm1, %v35_v12 }
   0xe   :  { %495 = vmatprep.mubr.msk.f32.mxu0 %vm54_vm1, %v20_v13  ;;  %519 = vmatprep.mubr.msk.f32.mxu1 %vm54_vm1, %v36_v14 }
  0x11   :  { %496 = vmatmul.mubr.msk.f32.gmra.mrb[6].mxu0 %vm54_vm1, %v21_v15  ;;  %520 = vmatmul.mubr.msk.f32.gmra.mrb[6].mxu1 %vm54_vm1, %v37_v16 }
  0x12   :  { %498 = vmatprep.mubr.msk.f32.mxu0 %vm54_vm1, %v22_v17  ;;  %522 = vmatprep.mubr.msk.f32.mxu1 %vm54_vm1, %v38_v18 }
  0x15   :  { %499 = vmatmul.mubr.msk.f32.gmra.mrb[8].mxu0 %vm54_vm1, %v23_v19  ;;  %523 = vmatmul.mubr.msk.f32.gmra.mrb[8].mxu1 %vm54_vm1, %v39_v20 }
  0x16   :  { %501 = vmatprep.mubr.msk.f32.mxu0 %vm54_vm1, %v24_v21  ;;  %525 = vmatprep.mubr.msk.f32.mxu1 %vm54_vm1, %v40_v22 }
  0x19   :  { %502 = vmatmul.mubr.msk.f32.gmra.mrb[10].mxu0 %vm54_vm1, %v25_v23  ;;  %526 = vmatmul.mubr.msk.f32.gmra.mrb[10].mxu1 %vm54_vm1, %v41_v24 }
  0x1a   :  { %504 = vmatprep.mubr.msk.f32.mxu0 %vm54_vm1, %v26_v25  ;;  %528 = vmatprep.mubr.msk.f32.mxu1 %vm54_vm1, %v42_v26 }
  0x1d   :  { %505 = vmatmul.mubr.msk.f32.gmra.mrb[12].mxu0 %vm54_vm1, %v27_v27  ;;  %529 = vmatmul.mubr.msk.f32.gmra.mrb[12].mxu1 %vm54_vm1, %v43_v28 }
  0x1e   :  { %507 = vmatprep.mubr.msk.f32.mxu0 %vm54_vm1, %v28_v29  ;;  %531 = vmatprep.mubr.msk.f32.mxu1 %vm54_vm1, %v44_v30 }
  0x21   :  { %508 = vmatmul.mubr.msk.f32.gmra.mrb[14].mxu0 %vm54_vm1, %v29_v31  ;;  %532 = vmatmul.mubr.msk.f32.gmra.mrb[14].mxu1 %vm54_vm1, %v45_v32 }
  0xd8   :  { %v488_v34 = vpop.f32.mrb[0].mxu0  ;;  %v512_v35 = vpop.f32.mrb[0].mxu1 }
  0xd9   :  { %v227_v36 = vadd.f32 %v488_v34, %v690_v33  ;;  %v307_v37 = vadd.f32 %v512_v35, %v690_v33  ;;  %v221_v38 = vpop.f32.mrb[1].mxu0  ;;  %v301_v39 = vpop.f32.mrb[1].mxu1 }
  0xda   :  { %v222_v40 = vadd.f32 %v690_v33, %v221_v38  ;;  %v302_v41 = vadd.f32 %v690_v33, %v301_v39 }
  0xdb   :  { %382 = vst.msk [vmem:[%s855_s3 + $0x8] sm:$0xff] %vm380_vm2, %v227_v36  ;;  %398 = vst.msk [vmem:[%s855_s3 + $0x88] sm:$0xff] %vm380_vm2, %v307_v37 }
  0xdc   :  { %381 = vst.msk [vmem:[%s855_s3] sm:$0xff] %vm380_vm2, %v222_v40  ;;  %397 = vst.msk [vmem:[%s855_s3 + $0x80] sm:$0xff] %vm380_vm2, %v302_v41  ;;  %v491_v42 = vpop.f32.mrb[2].mxu0  ;;  %v515_v43 = vpop.f32.mrb[2].mxu1 }
  0xdd   :  { %v237_v44 = vadd.f32 %v491_v42, %v690_v33  ;;  %v317_v45 = vadd.f32 %v515_v43, %v690_v33  ;;  %v231_v46 = vpop.f32.mrb[3].mxu0  ;;  %v311_v47 = vpop.f32.mrb[3].mxu1 }
  0xde   :  { %v232_v48 = vadd.f32 %v690_v33, %v231_v46  ;;  %v312_v49 = vadd.f32 %v690_v33, %v311_v47 }
  0xdf   :  { %384 = vst.msk [vmem:[%s855_s3 + $0x18] sm:$0xff] %vm380_vm2, %v237_v44  ;;  %400 = vst.msk [vmem:[%s855_s3 + $0x98] sm:$0xff] %vm380_vm2, %v317_v45 }
  0xe0   :  { %383 = vst.msk [vmem:[%s855_s3 + $0x10] sm:$0xff] %vm380_vm2, %v232_v48  ;;  %399 = vst.msk [vmem:[%s855_s3 + $0x90] sm:$0xff] %vm380_vm2, %v312_v49  ;;  %v494_v50 = vpop.f32.mrb[4].mxu0  ;;  %v518_v51 = vpop.f32.mrb[4].mxu1 }
  0xe1   :  { %v247_v52 = vadd.f32 %v494_v50, %v690_v33  ;;  %v327_v53 = vadd.f32 %v518_v51, %v690_v33  ;;  %v241_v54 = vpop.f32.mrb[5].mxu0  ;;  %v321_v55 = vpop.f32.mrb[5].mxu1 }
  0xe2   :  { %v242_v56 = vadd.f32 %v690_v33, %v241_v54  ;;  %v322_v57 = vadd.f32 %v690_v33, %v321_v55 }
  0xe3   :  { %386 = vst.msk [vmem:[%s855_s3 + $0x28] sm:$0xff] %vm380_vm2, %v247_v52  ;;  %402 = vst.msk [vmem:[%s855_s3 + $0xa8] sm:$0xff] %vm380_vm2, %v327_v53 }
  0xe4   :  { %385 = vst.msk [vmem:[%s855_s3 + $0x20] sm:$0xff] %vm380_vm2, %v242_v56  ;;  %401 = vst.msk [vmem:[%s855_s3 + $0xa0] sm:$0xff] %vm380_vm2, %v322_v57  ;;  %v497_v58 = vpop.f32.mrb[6].mxu0  ;;  %v521_v59 = vpop.f32.mrb[6].mxu1 }
  0xe5   :  { %v257_v60 = vadd.f32 %v497_v58, %v690_v33  ;;  %v337_v61 = vadd.f32 %v521_v59, %v690_v33  ;;  %v251_v62 = vpop.f32.mrb[7].mxu0  ;;  %v331_v63 = vpop.f32.mrb[7].mxu1 }
  0xe6   :  { %v252_v0 = vadd.f32 %v690_v33, %v251_v62  ;;  %v332_v1 = vadd.f32 %v690_v33, %v331_v63 }
  0xe7   :  { %388 = vst.msk [vmem:[%s855_s3 + $0x38] sm:$0xff] %vm380_vm2, %v257_v60  ;;  %404 = vst.msk [vmem:[%s855_s3 + $0xb8] sm:$0xff] %vm380_vm2, %v337_v61 }
  0xe8   :  { %387 = vst.msk [vmem:[%s855_s3 + $0x30] sm:$0xff] %vm380_vm2, %v252_v0  ;;  %403 = vst.msk [vmem:[%s855_s3 + $0xb0] sm:$0xff] %vm380_vm2, %v332_v1  ;;  %v500_v2 = vpop.f32.mrb[8].mxu0  ;;  %v524_v3 = vpop.f32.mrb[8].mxu1 }
  0xe9   :  { %v267_v4 = vadd.f32 %v500_v2, %v690_v33  ;;  %v347_v5 = vadd.f32 %v524_v3, %v690_v33  ;;  %v261_v6 = vpop.f32.mrb[9].mxu0  ;;  %v341_v7 = vpop.f32.mrb[9].mxu1 }
  0xea   :  { %v262_v8 = vadd.f32 %v690_v33, %v261_v6  ;;  %v342_v9 = vadd.f32 %v690_v33, %v341_v7 }
  0xeb   :  { %390 = vst.msk [vmem:[%s855_s3 + $0x48] sm:$0xff] %vm380_vm2, %v267_v4  ;;  %406 = vst.msk [vmem:[%s855_s3 + $0xc8] sm:$0xff] %vm380_vm2, %v347_v5 }
  0xec   :  { %389 = vst.msk [vmem:[%s855_s3 + $0x40] sm:$0xff] %vm380_vm2, %v262_v8  ;;  %405 = vst.msk [vmem:[%s855_s3 + $0xc0] sm:$0xff] %vm380_vm2, %v342_v9  ;;  %v503_v10 = vpop.f32.mrb[10].mxu0  ;;  %v527_v11 = vpop.f32.mrb[10].mxu1 }
  0xed   :  { %v277_v12 = vadd.f32 %v503_v10, %v690_v33  ;;  %v357_v13 = vadd.f32 %v527_v11, %v690_v33  ;;  %v271_v14 = vpop.f32.mrb[11].mxu0  ;;  %v351_v15 = vpop.f32.mrb[11].mxu1 }
  0xee   :  { %v272_v16 = vadd.f32 %v690_v33, %v271_v14  ;;  %v352_v17 = vadd.f32 %v690_v33, %v351_v15 }
  0xef   :  { %392 = vst.msk [vmem:[%s855_s3 + $0x58] sm:$0xff] %vm380_vm2, %v277_v12  ;;  %408 = vst.msk [vmem:[%s855_s3 + $0xd8] sm:$0xff] %vm380_vm2, %v357_v13 }
  0xf0   :  { %391 = vst.msk [vmem:[%s855_s3 + $0x50] sm:$0xff] %vm380_vm2, %v272_v16  ;;  %407 = vst.msk [vmem:[%s855_s3 + $0xd0] sm:$0xff] %vm380_vm2, %v352_v17  ;;  %v506_v18 = vpop.f32.mrb[12].mxu0  ;;  %v530_v19 = vpop.f32.mrb[12].mxu1 }
  0xf1   :  { %v287_v20 = vadd.f32 %v506_v18, %v690_v33  ;;  %v367_v21 = vadd.f32 %v530_v19, %v690_v33  ;;  %v281_v22 = vpop.f32.mrb[13].mxu0  ;;  %v361_v23 = vpop.f32.mrb[13].mxu1 }
  0xf2   :  { %v282_v24 = vadd.f32 %v690_v33, %v281_v22  ;;  %v362_v25 = vadd.f32 %v690_v33, %v361_v23 }
  0xf3   :  { %394 = vst.msk [vmem:[%s855_s3 + $0x68] sm:$0xff] %vm380_vm2, %v287_v20  ;;  %410 = vst.msk [vmem:[%s855_s3 + $0xe8] sm:$0xff] %vm380_vm2, %v367_v21 }
  0xf4   :  { %393 = vst.msk [vmem:[%s855_s3 + $0x60] sm:$0xff] %vm380_vm2, %v282_v24  ;;  %409 = vst.msk [vmem:[%s855_s3 + $0xe0] sm:$0xff] %vm380_vm2, %v362_v25  ;;  %v509_v26 = vpop.f32.mrb[14].mxu0  ;;  %v533_v27 = vpop.f32.mrb[14].mxu1 }
  0xf5   :  { %v297_v28 = vadd.f32 %v509_v26, %v690_v33  ;;  %v377_v29 = vadd.f32 %v533_v27, %v690_v33  ;;  %v291_v30 = vpop.f32.mrb[15].mxu0  ;;  %v371_v31 = vpop.f32.mrb[15].mxu1 }
  0xf6   :  { %v292_v32 = vadd.f32 %v690_v33, %v291_v30  ;;  %v372_v34 = vadd.f32 %v690_v33, %v371_v31 }
  0xf7   :  { %396 = vst.msk [vmem:[%s855_s3 + $0x78] sm:$0xff] %vm380_vm2, %v297_v28  ;;  %412 = vst.msk [vmem:[%s855_s3 + $0xf8] sm:$0xff] %vm380_vm2, %v377_v29 }
  0xf8   :  { %395 = vst.msk [vmem:[%s855_s3 + $0x70] sm:$0xff] %vm380_vm2, %v292_v32  ;;  %411 = vst.msk [vmem:[%s855_s3 + $0xf0] sm:$0xff] %vm380_vm2, %v372_v34 }

</bundles_post_ra>
